<compile_context>
chip_gen: v7x
topology: tpu7x:2x2x1
jax: 0.10.0
libtpu: 0.0.40
codegen_flags: <defaults>
</compile_context>

<pallas_src>
import jax
import jax.numpy as jnp
from jax.experimental import pallas as pl
from jax.experimental.pallas import tpu as pltpu


_LANE = 128      # lane tile (last dim)
_SUBLANE = 8     # sublane tile (second-to-last dim, f32)


# --------------------------------------------------------------------------
# Pallas kernel: fused  out = sqrt_ab * x0 + sqrt_1m_ab * eta   (per block)
# --------------------------------------------------------------------------
def _ddpm_noising_kernel(sa_ref, sb_ref, x0_ref, eta_ref, out_ref):
    sa = sa_ref[...]                                   # (bn, 1) f32, lane-broadcast
    sb = sb_ref[...]                                   # (bn, 1) f32
    x0 = x0_ref[...].astype(jnp.float32)
    eta = eta_ref[...].astype(jnp.float32)
    out_ref[...] = (sa * x0 + sb * eta).astype(out_ref.dtype)


def _pick_block(size, tile, cap_tiles):
    """Block size (multiple of `tile`, <= cap_tiles*tile) + padded dim it divides."""
    n_tiles = -(-size // tile)                         # cdiv
    blk_tiles = min(n_tiles, cap_tiles)
    padded_tiles = -(-n_tiles // blk_tiles) * blk_tiles
    return blk_tiles * tile, padded_tiles * tile


def ddpm_noising_pallas(sqrt_ab, sqrt_1m_ab, x0_flat, eta_flat):
    """sqrt_ab, sqrt_1m_ab: (N, 1) f32;  x0_flat, eta_flat: (N, D)  ->  (N, D)."""
    n, d = x0_flat.shape
    out_dtype = x0_flat.dtype

    # bn <= 256 rows (multiple of 8), bd <= 1024 lanes (multiple of 128).
    bn, n_pad = _pick_block(n, _SUBLANE, 32)
    bd, d_pad = _pick_block(d, _LANE, 8)

    def pad2(a, rows, cols):
        pr, pc = rows - a.shape[0], cols - a.shape[1]
        if pr or pc:
            a = jnp.pad(a, ((0, pr), (0, pc)))
        return a

    sa = pad2(sqrt_ab.astype(jnp.float32), n_pad, 1)
    sb = pad2(sqrt_1m_ab.astype(jnp.float32), n_pad, 1)
    x0p = pad2(x0_flat, n_pad, d_pad)
    etap = pad2(eta_flat, n_pad, d_pad)

    # d is the fast grid axis: the (bn, 1) scalar blocks keep the same block
    # index across it, so Pallas does not re-DMA them per d step.
    grid = (n_pad // bn, d_pad // bd)

    scalar_spec = pl.BlockSpec((bn, 1), lambda i, j: (i, 0))
    data_spec = pl.BlockSpec((bn, bd), lambda i, j: (i, j))

    out = pl.pallas_call(
        _ddpm_noising_kernel,
        out_shape=jax.ShapeDtypeStruct((n_pad, d_pad), out_dtype),
        grid=grid,
        in_specs=[scalar_spec, scalar_spec, data_spec, data_spec],
        out_specs=data_spec,
        compiler_params=pltpu.CompilerParams(
            dimension_semantics=("parallel", "parallel"),
            vmem_limit_bytes=32 * 1024 * 1024,
        ),
    )(sa, sb, x0p, etap)

    if (n_pad, d_pad) != (n, d):
        out = out[:n, :d]
    return out


# --------------------------------------------------------------------------
# MyDDPM equivalent (forward pass only)
# --------------------------------------------------------------------------
class MyDDPMPallas:
    def __init__(self, network=None, n_steps=1000, min_beta=1e-4, max_beta=0.02,
                 image_chw=(1, 28, 28)):
        self.n_steps = n_steps
        self.image_chw = image_chw
        # TODO(synk): self.network (UNet) is only used by .backward, which is
        # not part of this forward pass and is not implemented here.
        self.network = network
        self.betas = jnp.linspace(min_beta, max_beta, n_steps, dtype=jnp.float32)
        self.alphas = 1.0 - self.betas
        self.alpha_bars = jnp.cumprod(self.alphas)

    def forward(self, x0, t, eta=None, key=None):
        n, c, h, w = x0.shape
        if eta is None:
            eta = jax.random.normal(
                key if key is not None else jax.random.PRNGKey(0),
                (n, c, h, w), dtype=jnp.float32)
        a_bar = self.alpha_bars[t].astype(jnp.float32).reshape(n, 1)   # gather = glue
        sqrt_ab = jnp.sqrt(a_bar)               # N scalars, computed outside the
        sqrt_1m_ab = jnp.sqrt(1.0 - a_bar)      # HBM-bound streaming kernel
        d = c * h * w
        x0_flat = x0.reshape(n, d).astype(jnp.float32)
        eta_flat = eta.reshape(n, d).astype(jnp.float32)
        noisy_flat = ddpm_noising_pallas(sqrt_ab, sqrt_1m_ab, x0_flat, eta_flat)
        return noisy_flat.reshape(n, c, h, w)


# --------------------------------------------------------------------------
# Reference (plain JAX) for the correctness check
# --------------------------------------------------------------------------
def _reference_forward(alpha_bars, x0, t, eta):
    n = x0.shape[0]
    a_bar = alpha_bars[t].reshape(n, 1, 1, 1)
    return jnp.sqrt(a_bar) * x0 + jnp.sqrt(1.0 - a_bar) * eta


if __name__ == "__main__":
    key = jax.random.PRNGKey(0)
    k_x, k_eta, k_t = jax.random.split(key, 3)

    n_steps = 1000
    batch, c, h, w = 2, 1, 28, 28           # matches default image_chw=(1, 28, 28)

    x0 = jax.random.normal(k_x, (batch, c, h, w), dtype=jnp.float32)
    eta = jax.random.normal(k_eta, (batch, c, h, w), dtype=jnp.float32)
    t = jax.random.randint(k_t, (batch,), 0, n_steps, dtype=jnp.int32)

    ddpm = MyDDPMPallas(n_steps=n_steps, image_chw=(c, h, w))

    noisy = jax.block_until_ready(ddpm.forward(x0, t, eta))

    ref = _reference_forward(ddpm.alpha_bars, x0, t, eta)
    assert noisy.shape == (batch, c, h, w)
    assert jnp.allclose(noisy, ref, atol=1e-5, rtol=1e-5), "mismatch vs reference"

    print("KERNEL_OK")
</pallas_src>

<mosaic_0001>
module attributes {stable_mosaic.version = 11 : i64} {
  func.func @_ddpm_noising_kernel(%arg0: i32, %arg1: i32, %arg2: memref<8x1xf32, #tpu.memory_space<vmem>>, %arg3: memref<8x1xf32, #tpu.memory_space<vmem>>, %arg4: memref<8x896xf32, #tpu.memory_space<vmem>>, %arg5: memref<8x896xf32, #tpu.memory_space<vmem>>, %arg6: memref<8x896xf32, #tpu.memory_space<vmem>>) attributes {dimension_semantics = [#tpu.dimension_semantics<parallel>, #tpu.dimension_semantics<parallel>], iteration_bounds = array<i64: 1, 1>, scalar_prefetch = 0 : i64, scratch_operands = 0 : i64, tpu.core_type = #tpu.core_type<tc>, window_params = [{transform_indices = @transform_0, window_bounds = array<i64: 8, 1>}, {transform_indices = @transform_1, window_bounds = array<i64: 8, 1>}, {transform_indices = @transform_2, window_bounds = array<i64: 8, 896>}, {transform_indices = @transform_3, window_bounds = array<i64: 8, 896>}, {transform_indices = @transform_4, window_bounds = array<i64: 8, 896>}]} {
    %c0 = arith.constant 0 : index
    %c0_0 = arith.constant 0 : index
    %0 = vector.load %arg2[%c0, %c0_0] : memref<8x1xf32, #tpu.memory_space<vmem>>, vector<8x1xf32>
    %c0_1 = arith.constant 0 : index
    %c0_2 = arith.constant 0 : index
    %1 = vector.load %arg3[%c0_1, %c0_2] : memref<8x1xf32, #tpu.memory_space<vmem>>, vector<8x1xf32>
    %c0_3 = arith.constant 0 : index
    %c0_4 = arith.constant 0 : index
    %2 = vector.load %arg4[%c0_3, %c0_4] : memref<8x896xf32, #tpu.memory_space<vmem>>, vector<8x896xf32>
    %c0_5 = arith.constant 0 : index
    %c0_6 = arith.constant 0 : index
    %3 = vector.load %arg5[%c0_5, %c0_6] : memref<8x896xf32, #tpu.memory_space<vmem>>, vector<8x896xf32>
    %4 = vector.broadcast %0 : vector<8x1xf32> to vector<8x896xf32>
    %5 = arith.mulf %4, %2 : vector<8x896xf32>
    %6 = vector.broadcast %1 : vector<8x1xf32> to vector<8x896xf32>
    %7 = arith.mulf %6, %3 : vector<8x896xf32>
    %8 = arith.addf %5, %7 : vector<8x896xf32>
    %c0_7 = arith.constant 0 : index
    %c0_8 = arith.constant 0 : index
    %9 = vector.load %arg6[%c0_7, %c0_8] : memref<8x896xf32, #tpu.memory_space<vmem>>, vector<8x896xf32>
    tpu.vector_store %arg6[%c0_7, %c0_8], %8 {strides = array<i32>} : memref<8x896xf32, #tpu.memory_space<vmem>>, vector<8x896xf32>,
    return
  }
  func.func @transform_0(%arg0: i32, %arg1: i32) -> (i32, i32) {
    %c0_i32 = arith.constant 0 : i32
    %c0_i32_0 = arith.constant 0 : i32
    return %arg0, %c0_i32 : i32, i32
  }
  func.func @transform_1(%arg0: i32, %arg1: i32) -> (i32, i32) {
    %c0_i32 = arith.constant 0 : i32
    %c0_i32_0 = arith.constant 0 : i32
    return %arg0, %c0_i32 : i32, i32
  }
  func.func @transform_2(%arg0: i32, %arg1: i32) -> (i32, i32) {
    %c0_i32 = arith.constant 0 : i32
    return %arg0, %arg1 : i32, i32
  }
  func.func @transform_3(%arg0: i32, %arg1: i32) -> (i32, i32) {
    %c0_i32 = arith.constant 0 : i32
    return %arg0, %arg1 : i32, i32
  }
  func.func @transform_4(%arg0: i32, %arg1: i32) -> (i32, i32) {
    %c0_i32 = arith.constant 0 : i32
    return %arg0, %arg1 : i32, i32
  }
}

</mosaic_0001>

<bundles_post_ra>
// kernel: tpu_custom_call.1
= control target key start
LH: loop header
LB: loop body
LE: loop exit
PB: predicated region body
PF: predicated region fallthrough
CT: control target
= control target key end

     0   :  { %9 = vsyncpa [#allocation3], 0  ;;  %s260_s0 = inlined_call_operand.vmem [shape: f32[8,1], index: 0, kind: input, shape index: {}]   ;;  %s261_s1 = inlined_call_operand.vmem [shape: f32[8,1], index: 1, kind: input, shape index: {}]   ;;  %s262_s2 = inlined_call_operand.hbm [shape: f32[8,896], index: 2, kind: input, shape index: {}]   ;;  %s263_s3 = inlined_call_operand.hbm [shape: f32[8,896], index: 3, kind: input, shape index: {}]   ;;  %s264_s4 = inlined_call_operand.hbm [shape: f32[8,896], index: 4, kind: output, shape index: {}]  }
   0x1   :  { %10 = vsyncpa [#allocation6], 0 }
   0x2   :  { %11 = vsyncpa [#allocation4], 0  ;;  %s189_s15 = smov [#allocation2]   ;;  %s190_s17 = smov [#allocation5]  }
   0x3   :  { %s22_s16 = sshll.u32 %s189_s15, 4  ;;  %s32_s18 = sshll.u32 %s190_s17, 4  ;;  %s23_s16 = int_to_ptr.vmem [resolvable:$true] %s22_s16  ;;  %s33_s18 = int_to_ptr.vmem [resolvable:$true] %s32_s18 }
   0x4   :  { %s117_s21 = scalar_lea.hbm %s262_s2, 896 }
   0x5   :  { %p118_p0 = scmp.ne.s32.totalorder %s262_s2, %s117_s21  ;;  %p121_p1 = scmp.lt.u32.totalorder %s117_s21, %s262_s2 }
   0x7   :  { %p123_p2 = pnand %p121_p1, %p118_p0 }
   0x9   :  { %126 = shalt.err (!%p123_p2)
}
   0xa   :  { %s127_s26 = scalar_lea.vmem %s23_s16, 896  ;;  %p132_p4 = scmp.lt.s32.totalorder %s23_s16, %s23_s16 }
   0xb   :  { %p128_p3 = scmp.ne.s32.totalorder %s23_s16, %s127_s26  ;;  %p133_p5 = scmp.lt.s32.totalorder %s127_s26, %s127_s26 }
   0xd   :  { %p134_p6 = por %p133_p5, %p132_p4 }
   0xf   :  { %p135_p7 = pnand %p134_p6, %p128_p3 }
  0x11   :  { %138 = shalt.err (!%p135_p7)
}
  0x12   :  { %25 = dma.hbm_to_vmem [thread:$0]  %s262_s2, 896, %s23_s16, [#allocation3]  }
  0x13   :  { %s139_s5 = scalar_lea.hbm %s263_s3, 896 }
  0x14   :  { %p140_p8 = scmp.ne.s32.totalorder %s263_s3, %s139_s5  ;;  %p143_p9 = scmp.lt.u32.totalorder %s139_s5, %s263_s3 }
  0x16   :  { %p145_p10 = pnand %p143_p9, %p140_p8 }
  0x18   :  { %148 = shalt.err (!%p145_p10)
}
  0x19   :  { %s149_s10 = scalar_lea.vmem %s33_s18, 896  ;;  %p154_p12 = scmp.lt.s32.totalorder %s33_s18, %s33_s18 }
  0x1a   :  { %p150_p11 = scmp.ne.s32.totalorder %s33_s18, %s149_s10  ;;  %p155_p13 = scmp.lt.s32.totalorder %s149_s10, %s149_s10 }
  0x1c   :  { %p156_p0 = por %p155_p13, %p154_p12 }
  0x1e   :  { %p157_p1 = pnand %p156_p0, %p150_p11 }
  0x20   :  { %160 = shalt.err (!%p157_p1)
}
  0x21   :  { %35 = dma.hbm_to_vmem [thread:$0]  %s263_s3, 896, %s33_s18, [#allocation6]  }
  0x22   :  { %183 = dma.done.wait [#allocation3], 896  }
  0x23   :  { %184 = vsyncadd [#allocation3], 4294966400 }
  0x24   :  { %185 = dma.done.wait [#allocation6], 896  }
  0x25   :  { %186 = vsyncadd [#allocation6], 4294966400  ;;  %v191_v0 = vmov 0   ;;  %v42_v1 = vld [vmem:[%s260_s0] sm:$0xff]  ;;  %v44_v3 = vld [vmem:[#allocation2] sm:$0xff]  ;;  %s192_s0 = smov [#allocation7]  }
  0x26   :  { %116 = vset.pattern.permute.xlu0 %v191_v0  ;;  %v43_v2 = vld [vmem:[%s261_s1] sm:$0xff]  ;;  %v45_v4 = vld [vmem:[#allocation2 + $0x8] sm:$0xff]  ;;  %v46_v5 = vld [vmem:[#allocation2 + $0x10] sm:$0xff]  ;;  %s102_s1 = sshll.u32 %s192_s0, 4  ;;  %s103_s1 = int_to_ptr.vmem [resolvable:$true] %s102_s1 }
  0x27   :  { %60 = vperm.xlu0 %116, %v42_v1   ;;  %v47_v6 = vld [vmem:[#allocation2 + $0x18] sm:$0xff]  ;;  %v48_v7 = vld [vmem:[#allocation2 + $0x20] sm:$0xff]  ;;  %v49_v9 = vld [vmem:[#allocation2 + $0x28] sm:$0xff]  ;;  %s161_s3 = scalar_lea.vmem %s103_s1, 896  ;;  %p166_p3 = scmp.lt.s32.totalorder %s103_s1, %s103_s1 }
  0x28   :  { %v50_v10 = vld [vmem:[#allocation2 + $0x30] sm:$0xff]  ;;  %v51_v11 = vld [vmem:[#allocation5] sm:$0xff]  ;;  %v52_v12 = vld [vmem:[#allocation5 + $0x8] sm:$0xff]  ;;  %p162_p2 = scmp.ne.s32.totalorder %s103_s1, %s161_s3  ;;  %p167_p4 = scmp.lt.s32.totalorder %s161_s3, %s161_s3 }
  0x29   :  { %v53_v13 = vld [vmem:[#allocation5 + $0x10] sm:$0xff]  ;;  %v54_v14 = vld [vmem:[#allocation5 + $0x18] sm:$0xff]  ;;  %v55_v17 = vld [vmem:[#allocation5 + $0x20] sm:$0xff] }
  0x2a   :  { %v56_v18 = vld [vmem:[#allocation5 + $0x28] sm:$0xff]  ;;  %v57_v19 = vld [vmem:[#allocation5 + $0x30] sm:$0xff]  ;;  %p168_p5 = por %p167_p4, %p166_p3 }
  0x2b   :  { %72 = vperm.xlu0 %116, %v43_v2  }
  0x2c   :  { %p169_p6 = pnand %p168_p5, %p162_p2 }
  0xa6   :  { %v61_v8 = vpop.permute.xlu0 %60 }
  0xa7   :  { %v63_v15 = vmul.f32 %v61_v8, %v44_v3  ;;  %v64_v16 = vmul.f32 %v61_v8, %v45_v4  ;;  %v65_v20 = vmul.f32 %v61_v8, %v46_v5  ;;  %v66_v21 = vmul.f32 %v61_v8, %v47_v6 }
  0xa8   :  { %v67_v22 = vmul.f32 %v61_v8, %v48_v7  ;;  %v68_v23 = vmul.f32 %v61_v8, %v49_v9  ;;  %v69_v29 = vmul.f32 %v61_v8, %v50_v10 }
  0xaa   :  { %v73_v24 = vpop.permute.xlu0 %72 }
  0xab   :  { %v75_v25 = vmul.f32 %v73_v24, %v51_v11  ;;  %v76_v26 = vmul.f32 %v73_v24, %v52_v12  ;;  %v77_v27 = vmul.f32 %v73_v24, %v53_v13  ;;  %v78_v28 = vmul.f32 %v73_v24, %v54_v14 }
  0xac   :  { %v79_v30 = vmul.f32 %v73_v24, %v55_v17  ;;  %v80_v31 = vmul.f32 %v73_v24, %v56_v18  ;;  %v81_v32 = vmul.f32 %v73_v24, %v57_v19 }
  0xad   :  { %v82_v33 = vadd.f32 %v75_v25, %v63_v15  ;;  %v83_v34 = vadd.f32 %v76_v26, %v64_v16  ;;  %v84_v35 = vadd.f32 %v77_v27, %v65_v20  ;;  %v85_v36 = vadd.f32 %v78_v28, %v66_v21 }
  0xae   :  { %v86_v37 = vadd.f32 %v79_v30, %v67_v22  ;;  %v87_v38 = vadd.f32 %v80_v31, %v68_v23  ;;  %v88_v39 = vadd.f32 %v81_v32, %v69_v29 }
  0xaf   :  { %89 = vst [vmem:[#allocation7] sm:$0xff] %v82_v33  ;;  %90 = vst [vmem:[#allocation7 + $0x8] sm:$0xff] %v83_v34 }
  0xb0   :  { %91 = vst [vmem:[#allocation7 + $0x10] sm:$0xff] %v84_v35  ;;  %92 = vst [vmem:[#allocation7 + $0x18] sm:$0xff] %v85_v36 }
  0xb1   :  { %93 = vst [vmem:[#allocation7 + $0x20] sm:$0xff] %v86_v37  ;;  %94 = vst [vmem:[#allocation7 + $0x28] sm:$0xff] %v87_v38 }
  0xb2   :  { %95 = vst [vmem:[#allocation7 + $0x30] sm:$0xff] %v88_v39 }
  0xb3   :  { %172 = shalt.err (!%p169_p6)
}
  0xb4   :  { %s173_s18 = scalar_lea.hbm %s264_s4, 896 }
  0xb5   :  { %p174_p7 = scmp.ne.s32.totalorder %s264_s4, %s173_s18  ;;  %p177_p8 = scmp.lt.u32.totalorder %s173_s18, %s264_s4 }
  0xb7   :  { %p179_p9 = pnand %p177_p8, %p174_p7 }
  0xb9   :  { %182 = shalt.err (!%p179_p9)
}
  0xba   :  { %105 = dma.vmem_to_hbm [thread:$0]  %s103_s1, 896, %s264_s4, [#allocation4]  }
  0xbb   :  { %187 = dma.done.wait [#allocation4], 896  }
  0xbc   :  { %188 = vsyncadd [#allocation4], 4294966400 }
  0xbd   :  { %109 = vsyncpa [#allocation3], 1 }
  0xbe   :  { %110 = vsyncpa [#allocation6], 1 }
  0xbf   :  { %111 = vsyncpa [#allocation4], 1 }

</bundles_post_ra>
